<compile_context>
chip_gen: v7x
topology: tpu7x:2x2x1
jax: 0.10.0
libtpu: 0.0.40
codegen_flags: <defaults>
</compile_context>

<pallas_src>
import functools
import math

import jax
import jax.numpy as jnp
from jax.experimental import pallas as pl
from jax.experimental.pallas import tpu as pltpu

_NEG_INF = -1e30  # class-padding mask; safe because the logits path stays f32


def _round_up(n, m):
    return (n + m - 1) // m * m


def _choose_tm(batch, max_tile=512):
    """Batch tile: multiple of 16 (bf16 packing), >=2 grid steps when the
    batch allows (v7x has 2 TensorCores), minimal last-tile padding."""
    n_tiles = max(1, math.ceil(batch / max_tile))
    if n_tiles < 2 and batch > 16:
        n_tiles = 2
    return _round_up(math.ceil(batch / n_tiles), 16)


def _const_spec(a):
    """VMEM-resident block (constant index_map), single-buffered."""
    index_map = lambda i: (0,) * a.ndim
    try:
        return pl.BlockSpec(a.shape, index_map, pipeline_mode=pl.Buffered(1))
    except (TypeError, ValueError):
        # Fallback for JAX versions without Buffered(1) support.
        return pl.BlockSpec(a.shape, index_map)


def _mlp_softmax_kernel(x_ref, w1_ref, b1_ref, w2_ref, b2_ref, w3_ref, b3_ref,
                        out_ref):
    # hidden1 + ReLU   (dropout1 == identity at inference)
    h1 = jnp.dot(x_ref[...], w1_ref[...], preferred_element_type=jnp.float32)
    h1 = jnp.maximum(h1 + b1_ref[...], 0.0)

    # hidden2 + ReLU   (dropout2 == identity at inference)
    h2 = jnp.dot(h1.astype(w2_ref.dtype), w2_ref[...],
                 preferred_element_type=jnp.float32)
    h2 = jnp.maximum(h2 + b2_ref[...], 0.0)

    # hidden3 + softmax. Padded class columns carry a -1e30 bias (baked into
    # b3 by prepare_params) so they vanish in the softmax without an
    # in-kernel iota/where mask.
    logits = jnp.dot(h2.astype(w3_ref.dtype), w3_ref[...],
                     preferred_element_type=jnp.float32)
    logits = logits + b3_ref[...]

    m = jnp.max(logits, axis=-1, keepdims=True)
    e = jnp.exp(logits - m)
    denom = jnp.sum(e, axis=-1, keepdims=True)
    out_ref[...] = (e * pl.reciprocal(denom, approx=True)).astype(out_ref.dtype)


def prepare_params(params):
    """Pad weights/biases to lane-dense (multiple-of-128) shapes and cast to
    bf16 ONCE -- hoisted out of the per-call path."""
    w1, b1 = params["w1"], params["b1"]
    w2, b2 = params["w2"], params["b2"]
    w3, b3 = params["w3"], params["b3"]
    D, H = w1.shape
    O = w3.shape[1]
    Dp, Hp, Op = _round_up(D, 128), _round_up(H, 128), _round_up(O, 128)

    def pad2(a, rows, cols, fill=0.0):
        return jnp.pad(a, ((0, rows - a.shape[0]), (0, cols - a.shape[1])),
                       constant_values=fill)

    return {
        "w1": pad2(w1, Dp, Hp).astype(jnp.bfloat16),
        "w2": pad2(w2, Hp, Hp).astype(jnp.bfloat16),
        "w3": pad2(w3, Hp, Op).astype(jnp.bfloat16),
        "b1": pad2(b1.astype(jnp.float32), 1, Hp),
        "b2": pad2(b2.astype(jnp.float32), 1, Hp),
        # -1e30 in padded class columns: bias add doubles as softmax mask.
        "b3": pad2(b3.astype(jnp.float32), 1, Op, fill=_NEG_INF),
    }


@functools.partial(jax.jit, static_argnames=("out_dim",))
def _forward_prepared(x, prepared, out_dim):
    w1_p, w2_p, w3_p = prepared["w1"], prepared["w2"], prepared["w3"]
    b1_p, b2_p, b3_p = prepared["b1"], prepared["b2"], prepared["b3"]

    B, D = x.shape
    Dp, Hp = w1_p.shape
    Op = w3_p.shape[1]

    TM = _choose_tm(B)
    Bp = _round_up(B, TM)
    grid = (Bp // TM,)

    x_p = jnp.pad(x, ((0, Bp - B), (0, Dp - D))).astype(jnp.bfloat16)

    # Explicit VMEM budget: single-buffered resident weights/biases,
    # double-buffered x/out tiles, f32 intermediates.
    weight_bytes = 2 * (Dp * Hp + Hp * Hp + Hp * Op)   # bf16, 1 buffer each
    bias_bytes = 4 * (2 * Hp + Op)                      # f32
    act_bytes = 2 * TM * Dp * 2 + 2 * TM * Op * 4       # 2-deep x / out buffers
    scratch_bytes = 4 * TM * (2 * Hp + 2 * Op)          # h1, h2, logits, exp
    footprint = weight_bytes + bias_bytes + act_bytes + scratch_bytes
    vmem_limit = int(min(max(2 * footprint, 32 * 1024 * 1024),
                         100 * 1024 * 1024))
    # TODO(synk): for very large D/H (resident bf16 weights approaching v7x's
    # 64 MiB/TC VMEM), stream w1/w2 over a K grid axis instead of keeping all
    # weights resident.

    cost = pl.CostEstimate(
        flops=2 * Bp * (Dp * Hp + Hp * Hp + Hp * Op),
        transcendentals=Bp * Op,
        bytes_accessed=Bp * Dp * 2 + weight_bytes + bias_bytes + Bp * Op * 4,
    )

    out_padded = pl.pallas_call(
        _mlp_softmax_kernel,
        out_shape=jax.ShapeDtypeStruct((Bp, Op), jnp.float32),
        grid=grid,
        in_specs=[
            pl.BlockSpec((TM, Dp), lambda i: (i, 0)),   # x streams over batch
            _const_spec(w1_p), _const_spec(b1_p),       # weights stay resident
            _const_spec(w2_p), _const_spec(b2_p),
            _const_spec(w3_p), _const_spec(b3_p),
        ],
        out_specs=pl.BlockSpec((TM, Op), lambda i: (i, 0)),
        compiler_params=pltpu.CompilerParams(
            dimension_semantics=("parallel",),
            vmem_limit_bytes=vmem_limit),
        cost_estimate=cost,
    )(x_p, w1_p, b1_p, w2_p, b2_p, w3_p, b3_p)

    return out_padded[:B, :out_dim]


def make_repr_classifier_no_pair(params):
    """Returns a jitted forward fn; weights are pre-padded/cast exactly once."""
    prepared = prepare_params(params)
    out_dim = int(params["w3"].shape[1])

    def forward(x):
        return _forward_prepared(x, prepared, out_dim=out_dim)

    return forward


def repr_classifier_no_pair(x, params):
    """One-shot convenience wrapper. Prefer make_repr_classifier_no_pair for
    repeated inference (weight pad/cast is not re-done per call)."""
    return make_repr_classifier_no_pair(params)(x)


def init_params(key, input_dim, hidden_dim, output_dim):
    """Deterministic PyTorch-style uniform(-1/sqrt(fan_in), 1/sqrt(fan_in))."""
    ks = jax.random.split(key, 6)

    def lin(kw, kb, fan_in, fan_out):
        bound = 1.0 / jnp.sqrt(fan_in)
        w = jax.random.uniform(kw, (fan_in, fan_out), jnp.float32, -bound, bound)
        b = jax.random.uniform(kb, (1, fan_out), jnp.float32, -bound, bound)
        return w, b

    w1, b1 = lin(ks[0], ks[1], input_dim, hidden_dim)
    w2, b2 = lin(ks[2], ks[3], hidden_dim, hidden_dim)
    w3, b3 = lin(ks[4], ks[5], hidden_dim, output_dim)
    return {"w1": w1, "b1": b1, "w2": w2, "b2": b2, "w3": w3, "b3": b3}


def reference_forward(x, p):
    """Pure-JAX f32 reference for correctness check."""
    h = jax.nn.relu(x @ p["w1"] + p["b1"])
    h = jax.nn.relu(h @ p["w2"] + p["b2"])
    return jax.nn.softmax(h @ p["w3"] + p["b3"], axis=-1)


if __name__ == "__main__":
    # Small shapes consistent with the module's forward: rep is [batch, input_dim].
    batch, input_dim, hidden_dim, output_dim = 8, 32, 32, 8
    dropout = 0.1  # unused at inference (identity)
    # TODO(synk): training-mode dropout masks not implemented (eval semantics).

    key = jax.random.PRNGKey(0)
    k_x, k_p = jax.random.split(key)
    x = jax.random.normal(k_x, (batch, input_dim), dtype=jnp.float32)
    params = init_params(k_p, input_dim, hidden_dim, output_dim)

    forward = make_repr_classifier_no_pair(params)  # weights padded/cast once
    out = jax.block_until_ready(forward(x))
    out = jax.block_until_ready(forward(x))         # cached/jitted fast path

    ref = reference_forward(x, params)
    assert out.shape == (batch, output_dim)
    # bf16 matmul inputs + approx reciprocal -> compare against the f32
    # reference with loosened tolerances.
    assert jnp.allclose(out, ref, atol=3e-2, rtol=0.0), "mismatch vs reference"
    assert jnp.allclose(jnp.sum(out, axis=-1), 1.0, atol=5e-3), "rows must sum to ~1"

    print("KERNEL_OK")
</pallas_src>

<mosaic_0001>
module attributes {stable_mosaic.version = 11 : i64} {
  func.func @_mlp_softmax_kernel(%arg0: i32, %arg1: memref<16x128xbf16, #tpu.memory_space<vmem>>, %arg2: memref<128x128xbf16, #tpu.memory_space<vmem>>, %arg3: memref<1x128xf32, #tpu.memory_space<vmem>>, %arg4: memref<128x128xbf16, #tpu.memory_space<vmem>>, %arg5: memref<1x128xf32, #tpu.memory_space<vmem>>, %arg6: memref<128x128xbf16, #tpu.memory_space<vmem>>, %arg7: memref<1x128xf32, #tpu.memory_space<vmem>>, %arg8: memref<16x128xf32, #tpu.memory_space<vmem>>) attributes {dimension_semantics = [#tpu.dimension_semantics<parallel>], iteration_bounds = array<i64: 1>, scalar_prefetch = 0 : i64, scratch_operands = 0 : i64, tpu.core_type = #tpu.core_type<tc>, window_params = [{transform_indices = @transform_0, window_bounds = array<i64: 16, 128>}, {pipeline_mode = #tpu.pipeline_mode<synchronous>, transform_indices = @transform_1, window_bounds = array<i64: 128, 128>}, {pipeline_mode = #tpu.pipeline_mode<synchronous>, transform_indices = @transform_2, window_bounds = array<i64: 1, 128>}, {pipeline_mode = #tpu.pipeline_mode<synchronous>, transform_indices = @transform_3, window_bounds = array<i64: 128, 128>}, {pipeline_mode = #tpu.pipeline_mode<synchronous>, transform_indices = @transform_4, window_bounds = array<i64: 1, 128>}, {pipeline_mode = #tpu.pipeline_mode<synchronous>, transform_indices = @transform_5, window_bounds = array<i64: 128, 128>}, {pipeline_mode = #tpu.pipeline_mode<synchronous>, transform_indices = @transform_6, window_bounds = array<i64: 1, 128>}, {transform_indices = @transform_7, window_bounds = array<i64: 16, 128>}]} {
    %c0 = arith.constant 0 : index
    %c0_0 = arith.constant 0 : index
    %0 = vector.load %arg1[%c0, %c0_0] : memref<16x128xbf16, #tpu.memory_space<vmem>>, vector<16x128xbf16>
    %c0_1 = arith.constant 0 : index
    %c0_2 = arith.constant 0 : index
    %1 = vector.load %arg2[%c0_1, %c0_2] : memref<128x128xbf16, #tpu.memory_space<vmem>>, vector<128x128xbf16>
    %cst = arith.constant dense<0.000000e+00> : vector<16x128xf32>
    %2 = tpu.matmul %0, %1, %cst {dimension_numbers = #tpu.dot_dimension_numbers<[1], [0], [0], [1], [0, 0, 1, 1], [], []>} : vector<16x128xbf16>, vector<128x128xbf16>, vector<16x128xf32> -> vector<16x128xf32>
    %c0_3 = arith.constant 0 : index
    %c0_4 = arith.constant 0 : index
    %3 = vector.load %arg3[%c0_3, %c0_4] : memref<1x128xf32, #tpu.memory_space<vmem>>, vector<1x128xf32>
    %4 = vector.broadcast %3 : vector<1x128xf32> to vector<16x128xf32>
    %5 = arith.addf %2, %4 : vector<16x128xf32>
    %cst_5 = arith.constant 0.000000e+00 : f32
    %6 = vector.broadcast %cst_5 : f32 to vector<16x128xf32>
    %7 = arith.maximumf %5, %6 : vector<16x128xf32>
    %8 = arith.truncf %7 : vector<16x128xf32> to vector<16x128xbf16>
    %c0_6 = arith.constant 0 : index
    %c0_7 = arith.constant 0 : index
    %9 = vector.load %arg4[%c0_6, %c0_7] : memref<128x128xbf16, #tpu.memory_space<vmem>>, vector<128x128xbf16>
    %cst_8 = arith.constant dense<0.000000e+00> : vector<16x128xf32>
    %10 = tpu.matmul %8, %9, %cst_8 {dimension_numbers = #tpu.dot_dimension_numbers<[1], [0], [0], [1], [0, 0, 1, 1], [], []>} : vector<16x128xbf16>, vector<128x128xbf16>, vector<16x128xf32> -> vector<16x128xf32>
    %c0_9 = arith.constant 0 : index
    %c0_10 = arith.constant 0 : index
    %11 = vector.load %arg5[%c0_9, %c0_10] : memref<1x128xf32, #tpu.memory_space<vmem>>, vector<1x128xf32>
    %12 = vector.broadcast %11 : vector<1x128xf32> to vector<16x128xf32>
    %13 = arith.addf %10, %12 : vector<16x128xf32>
    %cst_11 = arith.constant 0.000000e+00 : f32
    %14 = vector.broadcast %cst_11 : f32 to vector<16x128xf32>
    %15 = arith.maximumf %13, %14 : vector<16x128xf32>
    %16 = arith.truncf %15 : vector<16x128xf32> to vector<16x128xbf16>
    %c0_12 = arith.constant 0 : index
    %c0_13 = arith.constant 0 : index
    %17 = vector.load %arg6[%c0_12, %c0_13] : memref<128x128xbf16, #tpu.memory_space<vmem>>, vector<128x128xbf16>
    %cst_14 = arith.constant dense<0.000000e+00> : vector<16x128xf32>
    %18 = tpu.matmul %16, %17, %cst_14 {dimension_numbers = #tpu.dot_dimension_numbers<[1], [0], [0], [1], [0, 0, 1, 1], [], []>} : vector<16x128xbf16>, vector<128x128xbf16>, vector<16x128xf32> -> vector<16x128xf32>
    %c0_15 = arith.constant 0 : index
    %c0_16 = arith.constant 0 : index
    %19 = vector.load %arg7[%c0_15, %c0_16] : memref<1x128xf32, #tpu.memory_space<vmem>>, vector<1x128xf32>
    %20 = vector.broadcast %19 : vector<1x128xf32> to vector<16x128xf32>
    %21 = arith.addf %18, %20 : vector<16x128xf32>
    %cst_17 = arith.constant dense<0xFF800000> : vector<16xf32>
    %22 = vector.multi_reduction <maximumf>, %21, %cst_17 [1] : vector<16x128xf32> to vector<16xf32>
    %23 = vector.shape_cast %22 : vector<16xf32> to vector<16x1xf32>
    %24 = vector.broadcast %23 : vector<16x1xf32> to vector<16x128xf32>
    %25 = arith.subf %21, %24 : vector<16x128xf32>
    %26 = math.exp %25 : vector<16x128xf32>
    %cst_18 = arith.constant dense<0.000000e+00> : vector<16xf32>
    %27 = vector.multi_reduction <add>, %26, %cst_18 [1] : vector<16x128xf32> to vector<16xf32>
    %28 = vector.shape_cast %27 : vector<16xf32> to vector<16x1xf32>
    %29 = tpu.reciprocal %28 {approx = true} : vector<16x1xf32> -> vector<16x1xf32>
    %30 = vector.broadcast %29 : vector<16x1xf32> to vector<16x128xf32>
    %31 = arith.mulf %26, %30 : vector<16x128xf32>
    %c0_19 = arith.constant 0 : index
    %c0_20 = arith.constant 0 : index
    %32 = vector.load %arg8[%c0_19, %c0_20] : memref<16x128xf32, #tpu.memory_space<vmem>>, vector<16x128xf32>
    tpu.vector_store %arg8[%c0_19, %c0_20], %31 {strides = array<i32>} : memref<16x128xf32, #tpu.memory_space<vmem>>, vector<16x128xf32>,
    return
  }
  func.func @transform_0(%arg0: i32) -> (i32, i32) {
    %c0_i32 = arith.constant 0 : i32
    %c0_i32_0 = arith.constant 0 : i32
    return %arg0, %c0_i32 : i32, i32
  }
  func.func @transform_1(%arg0: i32) -> (i32, i32) {
    %c0_i32 = arith.constant 0 : i32
    %c0_i32_0 = arith.constant 0 : i32
    %c0_i32_1 = arith.constant 0 : i32
    return %c0_i32, %c0_i32_0 : i32, i32
  }
  func.func @transform_2(%arg0: i32) -> (i32, i32) {
    %c0_i32 = arith.constant 0 : i32
    %c0_i32_0 = arith.constant 0 : i32
    %c0_i32_1 = arith.constant 0 : i32
    return %c0_i32, %c0_i32_0 : i32, i32
  }
  func.func @transform_3(%arg0: i32) -> (i32, i32) {
    %c0_i32 = arith.constant 0 : i32
    %c0_i32_0 = arith.constant 0 : i32
    %c0_i32_1 = arith.constant 0 : i32
    return %c0_i32, %c0_i32_0 : i32, i32
  }
  func.func @transform_4(%arg0: i32) -> (i32, i32) {
    %c0_i32 = arith.constant 0 : i32
    %c0_i32_0 = arith.constant 0 : i32
    %c0_i32_1 = arith.constant 0 : i32
    return %c0_i32, %c0_i32_0 : i32, i32
  }
  func.func @transform_5(%arg0: i32) -> (i32, i32) {
    %c0_i32 = arith.constant 0 : i32
    %c0_i32_0 = arith.constant 0 : i32
    %c0_i32_1 = arith.constant 0 : i32
    return %c0_i32, %c0_i32_0 : i32, i32
  }
  func.func @transform_6(%arg0: i32) -> (i32, i32) {
    %c0_i32 = arith.constant 0 : i32
    %c0_i32_0 = arith.constant 0 : i32
    %c0_i32_1 = arith.constant 0 : i32
    return %c0_i32, %c0_i32_0 : i32, i32
  }
  func.func @transform_7(%arg0: i32) -> (i32, i32) {
    %c0_i32 = arith.constant 0 : i32
    %c0_i32_0 = arith.constant 0 : i32
    return %arg0, %c0_i32 : i32, i32
  }
}

</mosaic_0001>

<bundles_post_ra>
// kernel: _forward_prepared.1
= control target key start
LH: loop header
LB: loop body
LE: loop exit
PB: predicated region body
PF: predicated region fallthrough
CT: control target
= control target key end

     0   :  { %12 = vsyncpa [#allocation3], 0  ;;  %s816_s0 = inlined_call_operand.vmem [shape: bf16[16,128], index: 0, kind: input, shape index: {}]   ;;  %s817_s1 = inlined_call_operand.hbm [shape: bf16[128,128], index: 1, kind: input, shape index: {}]   ;;  %s818_s2 = inlined_call_operand.vmem [shape: f32[1,128], index: 2, kind: input, shape index: {}]   ;;  %s819_s3 = inlined_call_operand.hbm [shape: bf16[128,128], index: 3, kind: input, shape index: {}]   ;;  %s820_s4 = inlined_call_operand.vmem [shape: f32[1,128], index: 4, kind: input, shape index: {}]   ;;  %s821_s5 = inlined_call_operand.hbm [shape: bf16[128,128], index: 5, kind: input, shape index: {}]   ;;  %s822_s6 = inlined_call_operand.vmem [shape: f32[1,128], index: 6, kind: input, shape index: {}]   ;;  %s823_s7 = inlined_call_operand.vmem [shape: f32[16,128], index: 7, kind: output, shape index: {}]  }
   0x1   :  { %13 = vsyncpa [#allocation5], 0  ;;  %s669_s24 = smov [#allocation4]   ;;  %s670_s26 = smov [#allocation2]  }
   0x2   :  { %s35_s25 = sshll.u32 %s669_s24, 4  ;;  %s21_s27 = sshll.u32 %s670_s26, 4  ;;  %s36_s25 = int_to_ptr.vmem [resolvable:$true] %s35_s25  ;;  %s716_s27 = int_to_ptr.vmem [resolvable:$true] %s21_s27 }
   0x3   :  { %s599_s30 = scalar_lea.hbm %s819_s3, 1024 }
   0x4   :  { %p600_p0 = scmp.ne.s32.totalorder %s819_s3, %s599_s30  ;;  %p603_p1 = scmp.lt.u32.totalorder %s599_s30, %s819_s3 }
   0x6   :  { %p605_p2 = pnand %p603_p1, %p600_p0 }
   0x8   :  { %608 = shalt.err (!%p605_p2)
}
   0x9   :  { %s609_s12 = scalar_lea.vmem %s36_s25, 1024  ;;  %p614_p4 = scmp.lt.s32.totalorder %s36_s25, %s36_s25 }
   0xa   :  { %p610_p3 = scmp.ne.s32.totalorder %s36_s25, %s609_s12  ;;  %p615_p5 = scmp.lt.s32.totalorder %s609_s12, %s609_s12 }
   0xc   :  { %p616_p6 = por %p615_p5, %p614_p4 }
   0xe   :  { %p617_p7 = pnand %p616_p6, %p610_p3 }
  0x10   :  { %620 = shalt.err (!%p617_p7)
}
  0x11   :  { %s671_s13 = smov 64   ;;  %s672_s14 = smov 4  }
  0x12   :  { %41 = dma.hbm_to_vmem [thread:$0]  %s819_s3, 1024, %s36_s25, [#allocation5], %s671_s13, %s671_s13, %s672_s14  }
  0x13   :  { %s621_s19 = scalar_lea.hbm %s817_s1, 1024 }
  0x14   :  { %p622_p8 = scmp.ne.s32.totalorder %s817_s1, %s621_s19  ;;  %p625_p9 = scmp.lt.u32.totalorder %s621_s19, %s817_s1 }
  0x16   :  { %p627_p10 = pnand %p625_p9, %p622_p8 }
  0x18   :  { %630 = shalt.err (!%p627_p10)
}
  0x19   :  { %s631_s24 = scalar_lea.vmem %s716_s27, 1024  ;;  %p636_p12 = scmp.lt.s32.totalorder %s716_s27, %s716_s27 }
  0x1a   :  { %p632_p11 = scmp.ne.s32.totalorder %s716_s27, %s631_s24  ;;  %p637_p13 = scmp.lt.s32.totalorder %s631_s24, %s631_s24 }
  0x1c   :  { %p638_p0 = por %p637_p13, %p636_p12 }
  0x1e   :  { %p639_p1 = pnand %p638_p0, %p632_p11 }
  0x20   :  { %642 = shalt.err (!%p639_p1)
}
  0x21   :  { %27 = dma.hbm_to_vmem [thread:$0]  %s817_s1, 1024, %s716_s27, [#allocation3], %s671_s13, %s671_s13, %s672_s14  }
  0x22   :  { %s673_s26 = smov [#allocation6]   ;;  %s643_s8 = scalar_lea.hbm %s821_s5, 1024 }
  0x23   :  { %s49_s28 = sshll.u32 %s673_s26, 4  ;;  %p644_p2 = scmp.ne.s32.totalorder %s821_s5, %s643_s8  ;;  %s50_s28 = int_to_ptr.vmem [resolvable:$true] %s49_s28 }
  0x24   :  { %p647_p3 = scmp.lt.u32.totalorder %s643_s8, %s821_s5 }
  0x26   :  { %p649_p4 = pnand %p647_p3, %p644_p2 }
  0x28   :  { %652 = shalt.err (!%p649_p4)
}
  0x29   :  { %s653_s15 = scalar_lea.vmem %s50_s28, 1024  ;;  %p658_p6 = scmp.lt.s32.totalorder %s50_s28, %s50_s28 }
  0x2a   :  { %p654_p5 = scmp.ne.s32.totalorder %s50_s28, %s653_s15  ;;  %p659_p7 = scmp.lt.s32.totalorder %s653_s15, %s653_s15 }
  0x2c   :  { %p660_p8 = por %p659_p7, %p658_p6 }
  0x2e   :  { %p661_p9 = pnand %p660_p8, %p654_p5 }
  0x30   :  { %664 = shalt.err (!%p661_p9)
}
  0x31   :  { %55 = dma.hbm_to_vmem [thread:$0]  %s821_s5, 1024, %s50_s28, [#allocation5], %s671_s13, %s671_s13, %s672_s14  }
  0x32   :  { %665 = dma.done.wait [#allocation3], 1024  }
  0x33   :  { %666 = vsyncadd [#allocation3], 4294966272 }
  0x34   :  { %667 = dma.done.wait [#allocation5], 2048  }
  0x35   :  { %668 = vsyncadd [#allocation5], 4294965248  ;;  %v674_v0 = vmov 0.0   ;;  %vm675_vm0 = vmmov 0   ;;  %v566_v1 = vld [vmem:[#allocation2] sm:$0xff]   ;;  %v567_v2 = vld [vmem:[#allocation2 + $0x8] sm:$0xff]  }
  0x36   :  { %499 = vmatprep.subr.bf16.mxu0 %v674_v0  ;;  %515 = vmatprep.mubr.msk.bf16.mxu0 %vm675_vm0, %v674_v0  ;;  %v568_v3 = vld [vmem:[#allocation2 + $0x10] sm:$0xff]   ;;  %v575_v4 = vld [vmem:[#allocation4] sm:$0xff]   ;;  %v569_v5 = vld [vmem:[#allocation2 + $0x18] sm:$0xff]  }
  0x37   :  { %519 = vmatprep.subr.bf16.mxu1 %v674_v0  ;;  %535 = vmatprep.mubr.msk.bf16.mxu1 %vm675_vm0, %v674_v0  ;;  %v576_v6 = vld [vmem:[#allocation4 + $0x8] sm:$0xff]   ;;  %v570_v7 = vld [vmem:[#allocation2 + $0x20] sm:$0xff]   ;;  %v577_v8 = vld [vmem:[#allocation4 + $0x10] sm:$0xff]  }
  0x38   :  { %500 = vmatpush3.bf16.msra.mxu0 %v566_v1  ;;  %520 = vmatpush3.bf16.msra.mxu1 %v575_v4  ;;  %v571_v9 = vld [vmem:[#allocation2 + $0x28] sm:$0xff]   ;;  %v578_v10 = vld [vmem:[#allocation4 + $0x18] sm:$0xff]   ;;  %v572_v11 = vld [vmem:[#allocation2 + $0x30] sm:$0xff]  }
  0x39   :  { %501 = vmatprep.subr.bf16.mxu0 %v674_v0  ;;  %521 = vmatprep.subr.bf16.mxu1 %v674_v0  ;;  %v579_v12 = vld [vmem:[#allocation4 + $0x20] sm:$0xff]   ;;  %v573_v13 = vld [vmem:[#allocation2 + $0x38] sm:$0xff]   ;;  %v580_v14 = vld [vmem:[#allocation4 + $0x28] sm:$0xff]  }
  0x3a   :  { %v574_v15 = vld [vmem:[%s816_s0] sm:$0xff]   ;;  %v581_v16 = vld [vmem:[#allocation4 + $0x30] sm:$0xff]   ;;  %v582_v17 = vld [vmem:[#allocation4 + $0x38] sm:$0xff]  }
  0x3b   :  { %v583_v18 = vld [vmem:[#allocation6] sm:$0xff]   ;;  %v584_v19 = vld [vmem:[#allocation6 + $0x8] sm:$0xff]   ;;  %v585_v20 = vld [vmem:[#allocation6 + $0x10] sm:$0xff]  }
  0x3c   :  { %502 = vmatpush3.bf16.msra.mxu0 %v567_v2  ;;  %522 = vmatpush3.bf16.msra.mxu1 %v576_v6  ;;  %v586_v21 = vld [vmem:[#allocation6 + $0x18] sm:$0xff]   ;;  %v587_v22 = vld [vmem:[#allocation6 + $0x20] sm:$0xff]   ;;  %v588_v23 = vld [vmem:[#allocation6 + $0x28] sm:$0xff]  }
  0x3d   :  { %503 = vmatprep.subr.bf16.mxu0 %v674_v0  ;;  %523 = vmatprep.subr.bf16.mxu1 %v674_v0  ;;  %v444_v24 = vld [vmem:[%s818_s2] ss:$0 sm:$0xff]  ;;  %v589_v34 = vld [vmem:[#allocation6 + $0x30] sm:$0xff]   ;;  %v590_v35 = vld [vmem:[#allocation6 + $0x38] sm:$0xff]  }
  0x3e   :  { %v454_v36 = vld [vmem:[%s820_s4] ss:$0 sm:$0xff] }
  0x3f   :  { %v463_v46 = vld [vmem:[%s822_s6] ss:$0 sm:$0xff] }
  0x40   :  { %504 = vmatpush3.bf16.msra.mxu0 %v568_v3  ;;  %524 = vmatpush3.bf16.msra.mxu1 %v577_v8 }
  0x41   :  { %505 = vmatprep.subr.bf16.mxu0 %v674_v0  ;;  %525 = vmatprep.subr.bf16.mxu1 %v674_v0 }
  0x44   :  { %506 = vmatpush3.bf16.msra.mxu0 %v569_v5  ;;  %526 = vmatpush3.bf16.msra.mxu1 %v578_v10 }
  0x45   :  { %507 = vmatprep.subr.bf16.mxu0 %v674_v0  ;;  %527 = vmatprep.subr.bf16.mxu1 %v674_v0 }
  0x48   :  { %508 = vmatpush3.bf16.msra.mxu0 %v570_v7  ;;  %528 = vmatpush3.bf16.msra.mxu1 %v579_v12 }
  0x49   :  { %509 = vmatprep.subr.bf16.mxu0 %v674_v0  ;;  %529 = vmatprep.subr.bf16.mxu1 %v674_v0 }
  0x4c   :  { %510 = vmatpush3.bf16.msra.mxu0 %v571_v9  ;;  %530 = vmatpush3.bf16.msra.mxu1 %v580_v14 }
  0x4d   :  { %511 = vmatprep.subr.bf16.mxu0 %v674_v0  ;;  %531 = vmatprep.subr.bf16.mxu1 %v674_v0 }
  0x50   :  { %512 = vmatpush3.bf16.msra.mxu0 %v572_v11  ;;  %532 = vmatpush3.bf16.msra.mxu1 %v581_v16 }
  0x51   :  { %513 = vmatprep.subr.bf16.mxu0 %v674_v0  ;;  %533 = vmatprep.subr.bf16.mxu1 %v674_v0 }
  0x54   :  { %514 = vmatpush3.bf16.msra.mxu0 %v573_v13  ;;  %534 = vmatpush3.bf16.msra.mxu1 %v582_v17 }
  0x55   :  { %539 = vmatprep.subr.bf16.mxu0 %v674_v0 }
  0x57   :  { %516 = vmatmul.mubr.bf16.vlgmr.msra.gmra.mrb[0].mxu0 %v574_v15 }
  0x58   :  { %555 = vmatprep.mubr.msk.bf16.mxu0 %vm675_vm0, %v674_v0  ;;  %540 = vmatpush3.bf16.msra.mxu0 %v583_v18 }
  0x59   :  { %541 = vmatprep.subr.bf16.mxu0 %v674_v0 }
  0x5c   :  { %542 = vmatpush3.bf16.msra.mxu0 %v584_v19 }
  0x5d   :  { %543 = vmatprep.subr.bf16.mxu0 %v674_v0 }
  0x60   :  { %544 = vmatpush3.bf16.msra.mxu0 %v585_v20 }
  0x61   :  { %545 = vmatprep.subr.bf16.mxu0 %v674_v0 }
  0x64   :  { %546 = vmatpush3.bf16.msra.mxu0 %v586_v21 }
  0x65   :  { %547 = vmatprep.subr.bf16.mxu0 %v674_v0 }
  0x68   :  { %548 = vmatpush3.bf16.msra.mxu0 %v587_v22 }
  0x69   :  { %549 = vmatprep.subr.bf16.mxu0 %v674_v0 }
  0x6c   :  { %550 = vmatpush3.bf16.msra.mxu0 %v588_v23 }
  0x6d   :  { %551 = vmatprep.subr.bf16.mxu0 %v674_v0 }
  0x70   :  { %552 = vmatpush3.bf16.msra.mxu0 %v589_v34 }
  0x71   :  { %553 = vmatprep.subr.bf16.mxu0 %v674_v0 }
  0x74   :  { %554 = vmatpush3.bf16.msra.mxu0 %v590_v35 }
 0x12a   :  { %v181_v25 = vpop.f32.mrb[0].mxu0 }
 0x12b   :  { %v182_v26 = vadd.f32 %v444_v24, %v181_v25  ;;  %v517_v27 = vpop.f32.mrb[1].mxu0 }
 0x12c   :  { %v184_v28 = vpop.f32.mrb[2].mxu0 }
 0x12d   :  { %v185_v29 = vadd.f32 %v444_v24, %v184_v28  ;;  %v518_v30 = vpop.f32.mrb[3].mxu0  ;;  %v188_v31 = vmax.f32 %v182_v26, 0.0 }
 0x12f   :  { %v189_v32 = vmax.f32 %v185_v29, 0.0 }
 0x131   :  { %v190_v33 = vpack.c.bf16 %v189_v32, %v188_v31 }
 0x133   :  { %536 = vmatmul.mubr.bf16.vlgmr.msra.gmra.mrb[0].mxu1 %v190_v33 }
 0x206   :  { %v296_v37 = vpop.f32.mrb[0].mxu1 }
 0x207   :  { %v297_v38 = vadd.f32 %v454_v36, %v296_v37  ;;  %v537_v39 = vpop.f32.mrb[1].mxu1 }
 0x208   :  { %v299_v40 = vpop.f32.mrb[2].mxu1 }
 0x209   :  { %v300_v41 = vadd.f32 %v454_v36, %v299_v40  ;;  %v538_v42 = vpop.f32.mrb[3].mxu1  ;;  %v303_v43 = vmax.f32 %v297_v38, 0.0 }
 0x20b   :  { %v304_v44 = vmax.f32 %v300_v41, 0.0 }
 0x20d   :  { %v305_v45 = vpack.c.bf16 %v304_v44, %v303_v43 }
 0x20f   :  { %556 = vmatmul.mubr.bf16.vlgmr.msra.gmra.mrb[4].mxu0 %v305_v45 }
 0x2e2   :  { %v411_v47 = vpop.f32.mrb[4].mxu0 }
 0x2e3   :  { %v412_v48 = vadd.f32 %v463_v46, %v411_v47  ;;  %v557_v49 = vpop.f32.mrb[5].mxu0 }
 0x2e4   :  { %v414_v50 = vpop.f32.mrb[6].mxu0 }
 0x2e5   :  { %418 = vmax.xlane.f32.xlu0 %v412_v48  ;;  %v558_v51 = vpop.f32.mrb[7].mxu0  ;;  %v415_v52 = vadd.f32 %v463_v46, %v414_v50 }
 0x2e9   :  { %420 = vmax.xlane.f32.xlu0 %v415_v52 }
 0x372   :  { %v419_v53 = vpop.xlane.xlu0 %418 }
 0x373   :  { %v422_v54 = vsub.f32 %v412_v48, %v419_v53 }
 0x375   :  { %v424_v55 = vmul.f32 1.442695, %v422_v54 }
 0x376   :  { %v421_v56 = vpop.xlane.xlu0 %420 }
 0x377   :  { %591 = vpow2.f32 %v424_v55  ;;  %v423_v57 = vsub.f32 %v415_v52, %v421_v56 }
 0x379   :  { %v426_v58 = vmul.f32 1.442695, %v423_v57 }
 0x37b   :  { %593 = vpow2.f32 %v426_v58 }
 0x381   :  { %v592_v59 = vpop.eup %591 }
 0x382   :  { %428 = vadd.xlane.f32.xlu1 %v592_v59 }
 0x385   :  { %v594_v60 = vpop.eup %593 }
 0x386   :  { %430 = vadd.xlane.f32.xlu1 %v594_v60 }
 0x40f   :  { %v429_v61 = vpop.xlane.xlu1 %428 }
 0x410   :  { %595 = vrcp.f32 %v429_v61 }
 0x413   :  { %v431_v62 = vpop.xlane.xlu1 %430 }
 0x414   :  { %597 = vrcp.f32 %v431_v62 }
 0x41a   :  { %v596_v63 = vpop.eup %595 }
 0x41b   :  { %v434_v0 = vmul.f32 %v596_v63, %v592_v59 }
 0x41d   :  { %436 = vst [vmem:[%s823_s7] sm:$0xff] %v434_v0 }
 0x41e   :  { %v598_v1 = vpop.eup %597 }
 0x41f   :  { %v435_v2 = vmul.f32 %v598_v1, %v594_v60 }
 0x421   :  { %437 = vst [vmem:[%s823_s7 + $0x8] sm:$0xff] %v435_v2 }
 0x422   :  { %442 = vsyncpa [#allocation3], 1 }
 0x423   :  { %443 = vsyncpa [#allocation5], 1 }

</bundles_post_ra>
